<compile_context>
chip_gen: v6e
topology: v6e:2x2x1
jax: 0.10.0
libtpu: 0.0.40
codegen_flags: <defaults>
</compile_context>

<pallas_src>
import jax
import jax.numpy as jnp
from jax.experimental import pallas as pl
from jax.experimental.pallas import tpu as pltpu


def _round_up(x, m):
    return (x + m - 1) // m * m


def _cdiv(a, b):
    return (a + b - 1) // b


def _vmem_capacity_bytes():
    """Per-core VMEM capacity; conservative fallback if the query is unavailable."""
    try:
        cap = int(getattr(pltpu.get_tpu_info(), "vmem_capacity_bytes"))
        if cap > 0:
            return cap
    except Exception:
        pass
    return 64 * 1024 * 1024  # v7x physical per-TC VMEM (most conservative)


_SINGLE_BUFFER_OK = None


def _single_buffer_supported():
    """Probe (once, eagerly) whether pipeline_mode=pl.Buffered(1) lowers + runs."""
    global _SINGLE_BUFFER_OK
    if _SINGLE_BUFFER_OK is not None:
        return _SINGLE_BUFFER_OK
    try:
        def _probe(x_ref, c_ref, o_ref):
            o_ref[...] = x_ref[...] + c_ref[...]

        out = pl.pallas_call(
            _probe,
            out_shape=jax.ShapeDtypeStruct((16, 128), jnp.float32),
            grid=(2,),
            in_specs=[
                pl.BlockSpec((8, 128), lambda i: (i, 0)),
                pl.BlockSpec((8, 128), lambda i: (0, 0),
                             pipeline_mode=pl.Buffered(1)),
            ],
            out_specs=pl.BlockSpec((8, 128), lambda i: (i, 0)),
        )(jnp.zeros((16, 128), jnp.float32), jnp.ones((8, 128), jnp.float32))
        out = jax.block_until_ready(out)
        if not bool(jnp.all(out == 1.0)):
            raise RuntimeError("Buffered(1) probe produced wrong values")
        _SINGLE_BUFFER_OK = True
    except Exception:
        _SINGLE_BUFFER_OK = False
    return _SINGLE_BUFFER_OK


def _const_spec(shape, n_grid_dims, single_buffer):
    """BlockSpec for a grid-invariant (VMEM-resident) operand.

    Single-buffered when supported: it never changes across grid steps, so
    default double-buffering would only burn VMEM.
    """
    if n_grid_dims == 1:
        idx = lambda i: (0,) * len(shape)
    else:
        idx = lambda i, k: (0,) * len(shape)
    if single_buffer:
        return pl.BlockSpec(shape, idx, pipeline_mode=pl.Buffered(1))
    return pl.BlockSpec(shape, idx)


# ----------------------------- kernels --------------------------------------


def _mlp_single_step_kernel(x_ref, w1_ref, b1_ref, w2_ref, b2_ref, o_ref):
    # Whole D reduction resident in VMEM: no scratch, no pl.when branches.
    # x_ref: [tm, Dp] bf16   w1_ref: [Dp, Hp] bf16   b1_ref: [1, Hp] f32
    # w2_ref: [Hp, Ep] bf16  b2_ref: [1, Ep] f32     o_ref: [tm, Ep] f32
    h = jnp.dot(x_ref[...], w1_ref[...], preferred_element_type=jnp.float32)
    h = jnp.maximum(h + b1_ref[...], 0.0)
    o_ref[...] = (jnp.dot(h.astype(w2_ref.dtype), w2_ref[...],
                          preferred_element_type=jnp.float32)
                  + b2_ref[...]).astype(o_ref.dtype)


def _mlp_ksplit_kernel(x_ref, w1_ref, b1_ref, w2_ref, b2_ref, o_ref, acc_ref):
    # K-streamed first matmul with an f32 VMEM accumulator; epilogue at last k.
    k = pl.program_id(1)

    @pl.when(k == 0)
    def _():
        acc_ref[...] = jnp.zeros_like(acc_ref)

    acc_ref[...] += jnp.dot(x_ref[...], w1_ref[...],
                            preferred_element_type=jnp.float32)

    @pl.when(k == pl.num_programs(1) - 1)
    def _():
        h = jnp.maximum(acc_ref[...] + b1_ref[...], 0.0)
        o_ref[...] = (jnp.dot(h.astype(w2_ref.dtype), w2_ref[...],
                              preferred_element_type=jnp.float32)
                      + b2_ref[...]).astype(o_ref.dtype)


# --------------------------- prepared params --------------------------------


@jax.tree_util.register_pytree_node_class
class TripletParams:
    """Weights cast to bf16 and padded to lane-dense TPU shapes ONCE (hot-path free)."""

    def __init__(self, w1, b1, w2, b2, dims):
        self.w1, self.b1, self.w2, self.b2 = w1, b1, w2, b2
        self.dims = dims  # (D, H, E, Dp, Hp, Ep, tk, single_buffer) -- static

    def tree_flatten(self):
        return (self.w1, self.b1, self.w2, self.b2), self.dims

    @classmethod
    def tree_unflatten(cls, aux, children):
        return cls(*children, aux)


def prepare_tripletnet_params(w1, b1, w2, b2, *, force_tk=None):
    """One-time prep: bf16 cast + lane-dense padding + tile-size selection."""
    D, H = w1.shape
    E = w2.shape[1]
    Dp0 = _round_up(D, 128)
    Hp = _round_up(H, 128)
    Ep = _round_up(E, 128)

    sbuf = _single_buffer_supported()  # probe eagerly, cache decision

    tm = 128  # worst-case row tile for budgeting
    cap = _vmem_capacity_bytes()
    budget = max(int(cap * 0.6), 16 * 1024 * 1024)

    def vmem_need(tk, multi_k):
        n = 2 * tm * tk * 2                        # x slabs (double-buffered)
        n += (2 if multi_k else 1) * tk * Hp * 2   # W1 (resident when single step)
        n += Hp * Ep * 2 + (Hp + Ep) * 4           # W2 + biases (single-buffered)
        n += 2 * tm * Ep * 4                       # output (double-buffered)
        if multi_k:
            n += tm * Hp * 4                       # f32 K accumulator scratch
        return n

    if force_tk is not None:
        tk = _round_up(min(force_tk, Dp0), 128)
        nk = _cdiv(Dp0, tk)
        tk = _round_up(_cdiv(Dp0, nk), 128)
        Dp = tk * nk
    elif vmem_need(Dp0, False) <= budget:
        tk = Dp0                                   # single K step
        Dp = Dp0
    else:
        # Largest 128-multiple slab that fits, then rebalance to minimize padding.
        fixed = Hp * Ep * 2 + (Hp + Ep) * 4 + 2 * tm * Ep * 4 + tm * Hp * 4
        per_tk = 4 * tm + 4 * Hp                   # bytes/K-column (bf16, 2x buffered)
        tk_max = max(128, ((budget - fixed) // per_tk) // 128 * 128)
        nk = _cdiv(Dp0, tk_max)
        tk = _round_up(_cdiv(Dp0, nk), 128)
        Dp = tk * nk

    w1_p = w1.astype(jnp.bfloat16)
    if (Dp, Hp) != (D, H):
        w1_p = jnp.pad(w1_p, ((0, Dp - D), (0, Hp - H)))
    w2_p = w2.astype(jnp.bfloat16)
    if (Hp, Ep) != (H, E):
        w2_p = jnp.pad(w2_p, ((0, Hp - H), (0, Ep - E)))
    b1_p = b1.reshape(1, -1).astype(jnp.float32)
    if Hp != H:
        b1_p = jnp.pad(b1_p, ((0, 0), (0, Hp - H)))
    b2_p = b2.reshape(1, -1).astype(jnp.float32)
    if Ep != E:
        b2_p = jnp.pad(b2_p, ((0, 0), (0, Ep - E)))

    return TripletParams(w1_p, b1_p, w2_p, b2_p,
                         (D, H, E, Dp, Hp, Ep, tk, bool(sbuf)))


# ------------------------------ forward -------------------------------------


def tripletnet_forward(x, y, z, prep):
    """Tripletnet.forward: one shared embeddingnet applied to x, y, z (fused)."""
    D, H, E, Dp, Hp, Ep, tk, sbuf = prep.dims
    B = x.shape[0]
    M = 3 * B

    # Flatten NCHW -> [B, D] and cast to bf16 BEFORE concatenating (half the
    # wrapper-side bytes for this memory-light kernel).
    def flat(a):
        return a.reshape(a.shape[0], -1).astype(jnp.bfloat16)

    xyz = jnp.concatenate([flat(x), flat(y), flat(z)], axis=0)
    assert xyz.shape[1] == D, "input feature dim does not match prepared weights"

    # Row padding / tiling.  tm=128 blocks for large M so Mp >= 256 gives >= 2
    # "parallel" row blocks (both v7x TensorCores get work).
    Mp = _round_up(M, 16)
    if Mp > 128:
        Mp = _round_up(Mp, 128)
        tm = 128
    else:
        tm = Mp
    if Mp != M or Dp != D:
        xyz = jnp.pad(xyz, ((0, Mp - M), (0, Dp - D)))

    n_rows = Mp // tm
    nk = Dp // tk
    single_step = (nk == 1)

    # VMEM limit from actual buffer sizes (worst case: everything 2x buffered)
    # plus headroom, clamped to the device capacity.
    buf_bytes = (2 * tm * tk * 2 + 2 * tk * Hp * 2 + 2 * Hp * Ep * 2
                 + 2 * (Hp + Ep) * 4 + 2 * tm * Ep * 4 + tm * Hp * 4)
    vmem_limit = int(min(_vmem_capacity_bytes(),
                         max(buf_bytes + (8 << 20), 32 << 20)))

    flops = 2 * Mp * Dp * Hp + 2 * Mp * Hp * Ep
    # Per-step streaming: x read once; W1 re-streamed per row block only when
    # the K axis is split; W2/biases fetched once; output written once.
    w1_bytes = Dp * Hp * 2 * (1 if single_step else n_rows)
    bytes_accessed = (Mp * Dp * 2 + w1_bytes + Hp * Ep * 2
                      + (Hp + Ep) * 4 + Mp * Ep * 4)
    cost = pl.CostEstimate(flops=flops, transcendentals=0,
                           bytes_accessed=bytes_accessed)

    # TODO(synk): output could be emitted in bf16 if the downstream triplet
    # loss tolerates it (halves writeback bytes); kept f32 for exactness here.
    if single_step:
        out = pl.pallas_call(
            _mlp_single_step_kernel,
            out_shape=jax.ShapeDtypeStruct((Mp, Ep), jnp.float32),
            grid_spec=pltpu.PrefetchScalarGridSpec(
                num_scalar_prefetch=0,
                grid=(n_rows,),
                in_specs=[
                    pl.BlockSpec((tm, Dp), lambda i: (i, 0)),   # x rows tile
                    _const_spec((Dp, Hp), 1, sbuf),             # W1 resident
                    _const_spec((1, Hp), 1, sbuf),              # b1
                    _const_spec((Hp, Ep), 1, sbuf),             # W2
                    _const_spec((1, Ep), 1, sbuf),              # b2
                ],
                out_specs=pl.BlockSpec((tm, Ep), lambda i: (i, 0)),
            ),
            compiler_params=pltpu.CompilerParams(
                dimension_semantics=("parallel",),
                vmem_limit_bytes=vmem_limit,
            ),
            cost_estimate=cost,
        )(xyz, prep.w1, prep.b1, prep.w2, prep.b2)
    else:
        out = pl.pallas_call(
            _mlp_ksplit_kernel,
            out_shape=jax.ShapeDtypeStruct((Mp, Ep), jnp.float32),
            grid_spec=pltpu.PrefetchScalarGridSpec(
                num_scalar_prefetch=0,
                grid=(n_rows, nk),
                in_specs=[
                    pl.BlockSpec((tm, tk), lambda i, k: (i, k)),  # x K slab
                    pl.BlockSpec((tk, Hp), lambda i, k: (k, 0)),  # W1 K slab
                    _const_spec((1, Hp), 2, sbuf),                # b1
                    _const_spec((Hp, Ep), 2, sbuf),               # W2
                    _const_spec((1, Ep), 2, sbuf),                # b2
                ],
                out_specs=pl.BlockSpec((tm, Ep), lambda i, k: (i, 0)),
                scratch_shapes=[pltpu.VMEM((tm, Hp), jnp.float32)],
            ),
            compiler_params=pltpu.CompilerParams(
                dimension_semantics=("parallel", "arbitrary"),
                vmem_limit_bytes=vmem_limit,
            ),
            cost_estimate=cost,
        )(xyz, prep.w1, prep.b1, prep.w2, prep.b2)

    # Padded rows [M:Mp] hold relu(b1)@W2+b2 garbage -> sliced off here.
    emb = out[:M, :E]
    return emb[:B], emb[B:2 * B], emb[2 * B:3 * B]


def init_params(key, in_features, hidden, emb_dim):
    k1, k2, k3, k4 = jax.random.split(key, 4)
    # Deterministic, small-scale init (synthetic weights, not a checkpoint).
    w1 = jax.random.normal(k1, (in_features, hidden), jnp.float32) * 0.02
    b1 = jax.random.normal(k2, (1, hidden), jnp.float32) * 0.02
    w2 = jax.random.normal(k3, (hidden, emb_dim), jnp.float32) * 0.02
    b2 = jax.random.normal(k4, (1, emb_dim), jnp.float32) * 0.02
    return w1, b1, w2, b2


if __name__ == "__main__":
    B, C, Hs, Ws = 2, 4, 16, 16        # NCHW images
    hidden, emb_dim = 32, 32
    in_features = C * Hs * Ws

    key = jax.random.PRNGKey(0)
    kx, ky, kz, kp = jax.random.split(key, 4)
    x = jax.random.normal(kx, (B, C, Hs, Ws), jnp.float32)
    y = jax.random.normal(ky, (B, C, Hs, Ws), jnp.float32)
    z = jax.random.normal(kz, (B, C, Hs, Ws), jnp.float32)
    w1, b1, w2, b2 = init_params(kp, in_features, hidden, emb_dim)

    # One-time weight prep (bf16 cast + pad + tiling) -- hoisted off the hot path.
    prep = prepare_tripletnet_params(w1, b1, w2, b2)

    fwd = jax.jit(tripletnet_forward)
    ex, ey, ez = fwd(x, y, z, prep)
    jax.block_until_ready((ex, ey, ez))

    # Reference #1: matches kernel numerics (bf16 operands, f32 accumulation).
    def ref_embed_bf16(a):
        a2 = a.reshape(a.shape[0], in_features).astype(jnp.bfloat16)
        h = jnp.maximum(
            jnp.dot(a2, w1.astype(jnp.bfloat16),
                    preferred_element_type=jnp.float32) + b1, 0.0)
        return jnp.dot(h.astype(jnp.bfloat16), w2.astype(jnp.bfloat16),
                       preferred_element_type=jnp.float32) + b2

    # Reference #2: the original pure-f32 module math (loose tol vs bf16 path;
    # at larger D the bf16 rounding could exceed this -- test fragility, not a bug).
    def ref_embed_f32(a):
        a2 = a.reshape(a.shape[0], in_features)
        h = jnp.maximum(a2 @ w1 + b1, 0.0)
        return h @ w2 + b2

    for got, inp in ((ex, x), (ey, y), (ez, z)):
        assert got.shape == (B, emb_dim)
        assert jnp.allclose(got, ref_embed_bf16(inp), atol=2e-3, rtol=2e-3)
        assert jnp.allclose(got, ref_embed_f32(inp), atol=5e-2, rtol=5e-2)

    # Also exercise the K-split path (streamed W1 slabs + f32 accumulator).
    prep_split = prepare_tripletnet_params(w1, b1, w2, b2, force_tk=256)
    ex2, ey2, ez2 = fwd(x, y, z, prep_split)
    jax.block_until_ready((ex2, ey2, ez2))
    for a_, b_ in ((ex, ex2), (ey, ey2), (ez, ez2)):
        assert jnp.allclose(a_, b_, atol=2e-3, rtol=2e-3)

    print("KERNEL_OK")
</pallas_src>

<mosaic_0001>
module attributes {stable_mosaic.version = 11 : i64} {
  func.func @_probe(%arg0: i32, %arg1: memref<8x128xf32, #tpu.memory_space<vmem>>, %arg2: memref<8x128xf32, #tpu.memory_space<vmem>>, %arg3: memref<8x128xf32, #tpu.memory_space<vmem>>) attributes {dimension_semantics = [#tpu.dimension_semantics<arbitrary>], iteration_bounds = array<i64: 2>, scalar_prefetch = 0 : i64, scratch_operands = 0 : i64, tpu.core_type = #tpu.core_type<tc>, window_params = [{transform_indices = @transform_0, window_bounds = array<i64: 8, 128>}, {pipeline_mode = #tpu.pipeline_mode<synchronous>, transform_indices = @transform_1, window_bounds = array<i64: 8, 128>}, {transform_indices = @transform_2, window_bounds = array<i64: 8, 128>}]} {
    %c0 = arith.constant 0 : index
    %c0_0 = arith.constant 0 : index
    %0 = vector.load %arg1[%c0, %c0_0] : memref<8x128xf32, #tpu.memory_space<vmem>>, vector<8x128xf32>
    %c0_1 = arith.constant 0 : index
    %c0_2 = arith.constant 0 : index
    %1 = vector.load %arg2[%c0_1, %c0_2] : memref<8x128xf32, #tpu.memory_space<vmem>>, vector<8x128xf32>
    %2 = arith.addf %0, %1 : vector<8x128xf32>
    %c0_3 = arith.constant 0 : index
    %c0_4 = arith.constant 0 : index
    %3 = vector.load %arg3[%c0_3, %c0_4] : memref<8x128xf32, #tpu.memory_space<vmem>>, vector<8x128xf32>
    tpu.vector_store %arg3[%c0_3, %c0_4], %2 {strides = array<i32>} : memref<8x128xf32, #tpu.memory_space<vmem>>, vector<8x128xf32>,
    return
  }
  func.func @transform_0(%arg0: i32) -> (i32, i32) {
    %c0_i32 = arith.constant 0 : i32
    %c0_i32_0 = arith.constant 0 : i32
    return %arg0, %c0_i32 : i32, i32
  }
  func.func @transform_1(%arg0: i32) -> (i32, i32) {
    %c0_i32 = arith.constant 0 : i32
    %c0_i32_0 = arith.constant 0 : i32
    %c0_i32_1 = arith.constant 0 : i32
    return %c0_i32, %c0_i32_0 : i32, i32
  }
  func.func @transform_2(%arg0: i32) -> (i32, i32) {
    %c0_i32 = arith.constant 0 : i32
    %c0_i32_0 = arith.constant 0 : i32
    return %arg0, %c0_i32 : i32, i32
  }
}

module attributes {stable_mosaic.version = 11 : i64} {
  func.func @_mlp_single_step_kernel(%arg0: i32, %arg1: memref<16x1024xbf16, #tpu.memory_space<vmem>>, %arg2: memref<1024x128xbf16, #tpu.memory_space<vmem>>, %arg3: memref<1x128xf32, #tpu.memory_space<vmem>>, %arg4: memref<128x128xbf16, #tpu.memory_space<vmem>>, %arg5: memref<1x128xf32, #tpu.memory_space<vmem>>, %arg6: memref<16x128xf32, #tpu.memory_space<vmem>>) attributes {dimension_semantics = [#tpu.dimension_semantics<parallel>], iteration_bounds = array<i64: 1>, scalar_prefetch = 0 : i64, scratch_operands = 0 : i64, tpu.core_type = #tpu.core_type<tc>, window_params = [{transform_indices = @transform_0, window_bounds = array<i64: 16, 1024>}, {pipeline_mode = #tpu.pipeline_mode<synchronous>, transform_indices = @transform_1, window_bounds = array<i64: 1024, 128>}, {pipeline_mode = #tpu.pipeline_mode<synchronous>, transform_indices = @transform_2, window_bounds = array<i64: 1, 128>}, {pipeline_mode = #tpu.pipeline_mode<synchronous>, transform_indices = @transform_3, window_bounds = array<i64: 128, 128>}, {pipeline_mode = #tpu.pipeline_mode<synchronous>, transform_indices = @transform_4, window_bounds = array<i64: 1, 128>}, {transform_indices = @transform_5, window_bounds = array<i64: 16, 128>}]} {
    %c0 = arith.constant 0 : index
    %c0_0 = arith.constant 0 : index
    %0 = vector.load %arg1[%c0, %c0_0] : memref<16x1024xbf16, #tpu.memory_space<vmem>>, vector<16x1024xbf16>
    %c0_1 = arith.constant 0 : index
    %c0_2 = arith.constant 0 : index
    %1 = vector.load %arg2[%c0_1, %c0_2] : memref<1024x128xbf16, #tpu.memory_space<vmem>>, vector<1024x128xbf16>
    %cst = arith.constant dense<0.000000e+00> : vector<16x128xf32>
    %2 = tpu.matmul %0, %1, %cst {dimension_numbers = #tpu.dot_dimension_numbers<[1], [0], [0], [1], [0, 0, 1, 1], [], []>} : vector<16x1024xbf16>, vector<1024x128xbf16>, vector<16x128xf32> -> vector<16x128xf32>
    %c0_3 = arith.constant 0 : index
    %c0_4 = arith.constant 0 : index
    %3 = vector.load %arg3[%c0_3, %c0_4] : memref<1x128xf32, #tpu.memory_space<vmem>>, vector<1x128xf32>
    %4 = vector.broadcast %3 : vector<1x128xf32> to vector<16x128xf32>
    %5 = arith.addf %2, %4 : vector<16x128xf32>
    %cst_5 = arith.constant 0.000000e+00 : f32
    %6 = vector.broadcast %cst_5 : f32 to vector<16x128xf32>
    %7 = arith.maximumf %5, %6 : vector<16x128xf32>
    %8 = arith.truncf %7 : vector<16x128xf32> to vector<16x128xbf16>
    %c0_6 = arith.constant 0 : index
    %c0_7 = arith.constant 0 : index
    %9 = vector.load %arg4[%c0_6, %c0_7] : memref<128x128xbf16, #tpu.memory_space<vmem>>, vector<128x128xbf16>
    %cst_8 = arith.constant dense<0.000000e+00> : vector<16x128xf32>
    %10 = tpu.matmul %8, %9, %cst_8 {dimension_numbers = #tpu.dot_dimension_numbers<[1], [0], [0], [1], [0, 0, 1, 1], [], []>} : vector<16x128xbf16>, vector<128x128xbf16>, vector<16x128xf32> -> vector<16x128xf32>
    %c0_9 = arith.constant 0 : index
    %c0_10 = arith.constant 0 : index
    %11 = vector.load %arg5[%c0_9, %c0_10] : memref<1x128xf32, #tpu.memory_space<vmem>>, vector<1x128xf32>
    %12 = vector.broadcast %11 : vector<1x128xf32> to vector<16x128xf32>
    %13 = arith.addf %10, %12 : vector<16x128xf32>
    %c0_11 = arith.constant 0 : index
    %c0_12 = arith.constant 0 : index
    %14 = vector.load %arg6[%c0_11, %c0_12] : memref<16x128xf32, #tpu.memory_space<vmem>>, vector<16x128xf32>
    tpu.vector_store %arg6[%c0_11, %c0_12], %13 {strides = array<i32>} : memref<16x128xf32, #tpu.memory_space<vmem>>, vector<16x128xf32>,
    return
  }
  func.func @transform_0(%arg0: i32) -> (i32, i32) {
    %c0_i32 = arith.constant 0 : i32
    %c0_i32_0 = arith.constant 0 : i32
    return %arg0, %c0_i32 : i32, i32
  }
  func.func @transform_1(%arg0: i32) -> (i32, i32) {
    %c0_i32 = arith.constant 0 : i32
    %c0_i32_0 = arith.constant 0 : i32
    %c0_i32_1 = arith.constant 0 : i32
    return %c0_i32, %c0_i32_0 : i32, i32
  }
  func.func @transform_2(%arg0: i32) -> (i32, i32) {
    %c0_i32 = arith.constant 0 : i32
    %c0_i32_0 = arith.constant 0 : i32
    %c0_i32_1 = arith.constant 0 : i32
    return %c0_i32, %c0_i32_0 : i32, i32
  }
  func.func @transform_3(%arg0: i32) -> (i32, i32) {
    %c0_i32 = arith.constant 0 : i32
    %c0_i32_0 = arith.constant 0 : i32
    %c0_i32_1 = arith.constant 0 : i32
    return %c0_i32, %c0_i32_0 : i32, i32
  }
  func.func @transform_4(%arg0: i32) -> (i32, i32) {
    %c0_i32 = arith.constant 0 : i32
    %c0_i32_0 = arith.constant 0 : i32
    %c0_i32_1 = arith.constant 0 : i32
    return %c0_i32, %c0_i32_0 : i32, i32
  }
  func.func @transform_5(%arg0: i32) -> (i32, i32) {
    %c0_i32 = arith.constant 0 : i32
    %c0_i32_0 = arith.constant 0 : i32
    return %arg0, %c0_i32 : i32, i32
  }
}

</mosaic_0001>

<bundles_post_ra>
// kernel: tpu_custom_call.1
= control target key start
LH: loop header
LB: loop body
LE: loop exit
PB: predicated region body
PF: predicated region fallthrough
CT: control target
= control target key end

     0   :  { %7 = vsyncpa [#allocation3], 0  ;;  %s649_s0 = inlined_call_operand.hbm [shape: f32[16,128], index: 0, kind: input, shape index: {}]   ;;  %s650_s1 = inlined_call_operand.hbm [shape: f32[8,128], index: 1, kind: input, shape index: {}]   ;;  %s651_s2 = inlined_call_operand.hbm [shape: f32[16,128], index: 2, kind: output, shape index: {}]  }
   0x1   :  { %9 = vsyncpa [#allocation3 + $0x1], 0 }
   0x2   :  { %10 = vsyncpa [#allocation6], 0 }
   0x3   :  { %11 = vsyncpa [#allocation4], 0 }
   0x4   :  { %13 = vsyncpa [#allocation4 + $0x1], 0  ;;  %s483_s9 = smov 0   ;;  %s485_s10 = smov 0  }
   0x5   :  { %s487_s11 = smov 0   ;;  %s489_s12 = smov 0  }
   0x6 LB: > { %s504_s13 = sadd.s32 4294967295, %s463_s12   ;;  %s270_s14 = sadd.s32 4294967294, %s463_s12   ;;  %s463_s12 = sphi %s489_s12, %s674_s12   ;;  %s459_s11 = sphi %s487_s11, %s673_s11   ;;  %s455_s10 = sphi %s485_s10, %s672_s10   ;;  %s451_s9 = sphi %s483_s9, %s671_s9  }
   0x7   : > { %p39_p0 = scmp.ne.s32.totalorder %s455_s10, %s451_s9  ;;  %p652_p1 = scmp.eq.s32.totalorder %s504_s13, 0 }
   0x8   : > { %p90_p3 = scmp.eq.s32.totalorder %s270_s14, 1  ;;  %p271_p5 = scmp.ge.s32.totalorder %s463_s12, 1 }
   0x9   : > { %p513_p4 = por %p652_p1, %p39_p0  ;;  %p97_p7 = scmp.lt.s32.totalorder %s463_s12, 3 }
   0xa   : > { %p518_p6 = por %p90_p3, %p39_p0  ;;  %s465_s18 = smov [#allocation5]  }
   0xb   : > { %s656_s15 = scalar_select %p513_p4, 1, 0 }
   0xc   : > { %s657_s16 = scalar_select %p518_p6, 1, 0 }
   0xd   : > { %p523_p8 = pnand %p271_p5, %p97_p7  ;;  %s110_s19 = sshll.u32 %s465_s18, 4  ;;  %s111_s19 = int_to_ptr.vmem [resolvable:$true] %s110_s19 }
   0xe   : > { %s531_s20 = sadd.s32 1, %s463_s12   ;;  %s26_s24 = sadd.s32 1, %s459_s11 }
   0xf   : > { %s658_s17 = scalar_select %p523_p8, 1, 0 }
  0x10   : > { %p292_p10 = pneg %p523_p8  ;;  %s23_s22 = ssub.s32 %s463_s12, %s531_s20 }
  0x11   : > { %p541_p12 = scmp.eq.s32.totalorder %s23_s22, 0  ;;  %p33_p13 = scmp.ne.s32.totalorder %s459_s11, %s455_s10 }
  0x12   : > { %p535_p11 = pnand %p292_p10, %p652_p1  ;;  %s352_s25 = scalar_lea.vmem %s111_s19, 128 }
  0x13   : > { %p353_p3 = scmp.ne.s32.totalorder %s111_s19, %s352_s25  ;;  %p360_p9 = scmp.lt.s32.totalorder %s111_s19, %s111_s19 }
  0x14   : > { %p343_p0 = pneg %p535_p11  ;;  %p361_p2 = scmp.lt.s32.totalorder %s352_s25, %s352_s25 }
  0x16   : > { %p355_p5 = pnand %p353_p3, %p343_p0  ;;  %p362_p10 = por %p361_p2, %p360_p9 }
  0x18   : > { %p356_p7 = pneg %p355_p5 }
  0x1a   : > { %p363_p1 = pnand %p362_p10, %p356_p7 }
  0x1c   : > { %366 = shalt.err (!%p363_p1)
}
  0x1d   : > { %295 = dma.hbm_to_vmem [thread:$0]  (!%p535_p11), %s650_s1, 128, %s111_s19, [#allocation6]  }
  0x1e   : > { %s558_s28 = scalar_select %p541_p12, %s459_s11, %s26_s24  }
  0x1f   : > { %p34_p1 = scmp.eq.s32.totalorder %s463_s12, 0  ;;  %p661_p2 = scmp.eq.s32.totalorder %s504_s13, 1 }
  0x20   : > { %p305_p0 = scmp.lt.s32.totalorder %s463_s12, 2  ;;  %s121_s30 = sand.u32 1, %s459_s11  }
  0x21   : > { %p566_p9 = por %p661_p2, %p33_p13  ;;  %p35_p3 = por %p34_p1, %p33_p13 }
  0x22   : > { %s274_s3 = sshll.u32 %s121_s30, 3  ;;  %s275_s4 = sshll.u32 %s463_s12, 7 }
  0x23   : > { %s662_s29 = scalar_select %p566_p9, 1, 0 }
  0x24   : > { %s579_s7 = scalar_lea.hbm %s649_s0, %s275_s4  ;;  %s125_s8 = scalar_lea.vmem [#allocation2], %s274_s3 }
  0x25   : > { %s132_s14 = sshll.u32 %s125_s8, 4  ;;  %p581_p11 = pnand %p305_p0, %p35_p3  ;;  %s133_s14 = int_to_ptr.vmem [resolvable:$true] %s132_s14 }
  0x26   : > { %s122_s19 = scalar_lea.sflag [#allocation3], %s121_s30  ;;  %s367_s21 = scalar_lea.hbm %s579_s7, 128 }
  0x27   : > { %p368_p12 = scmp.ne.s32.totalorder %s579_s7, %s367_s21  ;;  %p369_p13 = pneg %p581_p11 }
  0x28   : > { %s372_s24 = scalar_lea.hbm %s649_s0, 256  ;;  %p373_p10 = scmp.lt.s32.totalorder %s579_s7, %s649_s0 }
  0x29   : > { %p370_p5 = pnand %p369_p13, %p368_p12  ;;  %p374_p1 = scmp.lt.s32.totalorder %s372_s24, %s367_s21 }
  0x2b   : > { %p371_p7 = pneg %p370_p5  ;;  %p375_p2 = por %p374_p1, %p373_p10 }
  0x2d   : > { %p376_p0 = pnand %p375_p2, %p371_p7 }
  0x2f   : > { %379 = shalt.err (!%p376_p0)
}
  0x30   : > { %s380_s27 = scalar_lea.vmem %s133_s14, 128  ;;  %s466_s30 = smov [#allocation2]  }
  0x31   : > { %p381_p3 = scmp.ne.s32.totalorder %s133_s14, %s380_s27  ;;  %s385_s3 = sshll.u32 %s466_s30, 4  ;;  %s386_s3 = int_to_ptr.vmem [resolvable:$false] %s385_s3 }
  0x32   : > { %s387_s4 = scalar_lea.vmem %s386_s3, 256  ;;  %p388_p12 = scmp.lt.s32.totalorder %s133_s14, %s386_s3 }
  0x33   : > { %p383_p6 = pnand %p381_p3, %p369_p13  ;;  %p389_p5 = scmp.lt.s32.totalorder %s387_s4, %s380_s27 }
  0x35   : > { %p384_p9 = pneg %p383_p6  ;;  %p390_p4 = por %p389_p5, %p388_p12 }
  0x37   : > { %p391_p8 = pnand %p390_p4, %p384_p9 }
  0x39   : > { %394 = shalt.err (!%p391_p8)
}
  0x3a   : > { %299 = dma.hbm_to_vmem [thread:$0]  (!%p581_p11), %s579_s7, 128, %s133_s14, %s122_s19  }
  0x3b   : > { %p664_p7 = scmp.ne.s32.totalorder %s658_s17, 0 }
  0x3c   : > { %s602_s5 = sand.u32 (!%p664_p7), 1, %s455_s10   ;;  %p665_p6 = scmp.ne.s32.totalorder (!%p664_p7), %s656_s15, 0 }
  0x3d   : > { %141 = sbr.rel (%p664_p7) target bundleno = 95 (0x5f), region = 28  ;;  %s277_s6 = sshll.u32 (!%p664_p7), %s602_s5, 3 }
  0x3e   : > { %s144_s8 = scalar_lea.sflag (!%p664_p7), [#allocation3], %s602_s5  ;;  %s147_s21 = scalar_lea.vmem (!%p664_p7), [#allocation2], %s277_s6 }
  0x42   : > { %438 = dma.done.wait (%p665_p6), %s144_s8, 128  }
  0x43   : > { %440 = vsyncadd (%p665_p6), %s144_s8, 4294967168  ;;  %p666_p4 = scmp.eq.s32.totalorder %s504_s13, 0 }
  0x45   : > { %442 = dma.done.wait (%p666_p4), [#allocation6], 128   ;;  %p667_p8 = pmov %p666_p4 }
  0x46   : > { %s171_s17 = scalar_lea.vmem [#allocation7], %s277_s6  ;;  %s281_s14 = sshll.u32 %s504_s13, 7  ;;  %v172_v0 = vld [vmem:[%s147_s21] sm:$0xff]  ;;  %v173_v1 = vld [vmem:[#allocation5] sm:$0xff] }
  0x47   : > { %444 = vsyncadd (%p667_p8), [#allocation6], 4294967168  ;;  %s190_s7 = sshll.u32 %s171_s17, 4  ;;  %v174_v2 = vadd.f32 %v173_v1, %v172_v0  ;;  %s188_s15 = scalar_lea.hbm %s651_s2, %s281_s14  ;;  %s191_s7 = int_to_ptr.vmem [resolvable:$true] %s190_s7 }
  0x48   : > { %s177_s22 = scalar_lea.sflag [#allocation4], %s602_s5  ;;  %s395_s23 = scalar_lea.vmem %s191_s7, 128 }
  0x49   : > { %175 = vst [vmem:[%s171_s17] sm:$0xff] %v174_v2  ;;  %p396_p9 = scmp.ne.s32.totalorder %s191_s7, %s395_s23  ;;  %p668_p11 = scmp.ne.s32.totalorder %s662_s29, 0 }
  0x4a   : > { %s467_s24 = smov [#allocation7]  }
  0x4b   : > { %p397_p13 = pnand %p396_p9, %p668_p11  ;;  %s399_s25 = sshll.u32 %s467_s24, 4  ;;  %s400_s25 = int_to_ptr.vmem [resolvable:$false] %s399_s25 }
  0x4c   : > { %s401_s26 = scalar_lea.vmem %s400_s25, 256  ;;  %p402_p1 = scmp.lt.s32.totalorder %s191_s7, %s400_s25 }
  0x4d   : > { %p398_p10 = pneg %p397_p13  ;;  %p403_p2 = scmp.lt.s32.totalorder %s401_s26, %s395_s23 }
  0x4f   : > { %p404_p0 = por %p403_p2, %p402_p1 }
  0x51   : > { %p405_p3 = pnand %p404_p0, %p398_p10 }
  0x53   : > { %408 = shalt.err (!%p405_p3)
}
  0x54   : > { %s409_s13 = scalar_lea.hbm %s188_s15, 128  ;;  %s413_s3 = scalar_lea.hbm %s651_s2, 256 }
  0x55   : > { %p410_p12 = scmp.ne.s32.totalorder %s188_s15, %s409_s13  ;;  %p414_p6 = scmp.lt.s32.totalorder %s188_s15, %s651_s2 }
  0x56   : > { %p415_p4 = scmp.lt.s32.totalorder %s413_s3, %s409_s13 }
  0x57   : > { %p411_p5 = pnand %p410_p12, %p668_p11 }
  0x58   : > { %p416_p8 = por %p415_p4, %p414_p6 }
  0x59   : > { %p412_p7 = pneg %p411_p5 }
  0x5b   : > { %p417_p9 = pnand %p416_p8, %p412_p7 }
  0x5d   : > { %420 = shalt.err (!%p417_p9)
}
  0x5e   : > { %290 = dma.vmem_to_hbm [thread:$0]  (%p668_p11), %s191_s7, 128, %s188_s15, %s177_s22  }
  0x5f PF: > { %s202_s6 = sand.u32 1, %s451_s9   ;;  %p669_p13 = scmp.ne.s32.totalorder %s657_s16, 0 }
  0x60   : > { %p670_p10 = scmp.ge.s32.totalorder %s463_s12, 2  ;;  %s203_s8 = scalar_lea.sflag [#allocation4], %s202_s6 }
  0x62   : > { %p301_p1 = pnand %p670_p10, %p669_p13 }
  0x64   : > { %p302_p2 = pneg %p301_p1 }
  0x66   : > { %446 = dma.done.wait (%p302_p2), %s203_s8, 128  }
  0x67   : > { %448 = vsyncadd (%p302_p2), %s203_s8, 4294967168  ;;  %p16_p0 = scmp.ge.s32.totalorder %s531_s20, 4   ;;  %s671_s9 = smov %s455_s10 }
  0x68   : > { %s672_s10 = smov %s459_s11  ;;  %s673_s11 = smov %s558_s28 }
  0x69   : > { %s674_s12 = smov %s531_s20  ;;  %18 = sbr.rel (!%p16_p0) target bundleno = 6 (0x6), region = 77 }
  0x6e   :  { %208 = vsyncpa [#allocation3], 1 }
  0x6f   :  { %210 = vsyncpa [#allocation3 + $0x1], 1 }
  0x70   :  { %211 = vsyncpa [#allocation6], 1 }
  0x71   :  { %212 = vsyncpa [#allocation4], 1 }
  0x72   :  { %214 = vsyncpa [#allocation4 + $0x1], 1 }

// kernel: tripletnet_forward.1
= control target key start
LH: loop header
LB: loop body
LE: loop exit
PB: predicated region body
PF: predicated region fallthrough
CT: control target
= control target key end

     0   :  { %vm1147_vm0 = vmmov 0   ;;  %s1430_s1 = inlined_call_operand.vmem [shape: bf16[1024,128], index: 1, kind: input, shape index: {}]   ;;  %s1431_s0 = inlined_call_operand.vmem [shape: bf16[16,1024], index: 0, kind: input, shape index: {}]   ;;  %s1432_s3 = inlined_call_operand.vmem [shape: bf16[128,128], index: 3, kind: input, shape index: {}]   ;;  %s1433_s2 = inlined_call_operand.vmem [shape: f32[1,128], index: 2, kind: input, shape index: {}]   ;;  %s1434_s4 = inlined_call_operand.vmem [shape: f32[1,128], index: 4, kind: input, shape index: {}]   ;;  %s1435_s5 = inlined_call_operand.vmem [shape: f32[16,128], index: 5, kind: output, shape index: {}]  }
   0x1   :  { %v1074_v0 = vld [vmem:[%s1430_s1 + $0x78] sm:$0xff]   ;;  %v1078_v4 = vld [vmem:[%s1430_s1 + $0x70] sm:$0xff]   ;;  %v1082_v8 = vld [vmem:[%s1430_s1 + $0x68] sm:$0xff]  }
   0x2   :  { %v1075_v1 = vld [vmem:[%s1430_s1 + $0xf8] sm:$0xff]   ;;  %955 = vmatprep.subr.bf16.mxu0 %v1074_v0  ;;  %v1079_v5 = vld [vmem:[%s1430_s1 + $0xf0] sm:$0xff]   ;;  %v1083_v9 = vld [vmem:[%s1430_s1 + $0xe8] sm:$0xff]  }
   0x3   :  { %v1076_v2 = vld [vmem:[%s1430_s1 + $0x38] sm:$0xff]   ;;  %977 = vmatprep.subr.bf16.mxu1 %v1075_v1  ;;  %v1080_v6 = vld [vmem:[%s1430_s1 + $0x30] sm:$0xff]   ;;  %v1084_v10 = vld [vmem:[%s1430_s1 + $0x28] sm:$0xff]  }
   0x4   :  { %v1077_v3 = vld [vmem:[%s1430_s1 + $0xb8] sm:$0xff]   ;;  %956 = vmatpush3.bf16.msra.mxu0 %v1076_v2  ;;  %v1081_v7 = vld [vmem:[%s1430_s1 + $0xb0] sm:$0xff]   ;;  %v1085_v11 = vld [vmem:[%s1430_s1 + $0xa8] sm:$0xff]  }
   0x5   :  { %978 = vmatpush3.bf16.msra.mxu1 %v1077_v3  ;;  %957 = vmatprep.subr.bf16.mxu0 %v1078_v4  ;;  %v1086_v12 = vld [vmem:[%s1430_s1 + $0x60] sm:$0xff]   ;;  %v1090_v16 = vld [vmem:[%s1430_s1 + $0x58] sm:$0xff]   ;;  %v1094_v20 = vld [vmem:[%s1430_s1 + $0x50] sm:$0xff]  }
   0x6   :  { %979 = vmatprep.subr.bf16.mxu1 %v1079_v5  ;;  %v1087_v13 = vld [vmem:[%s1430_s1 + $0xe0] sm:$0xff]   ;;  %v1091_v17 = vld [vmem:[%s1430_s1 + $0xd8] sm:$0xff]   ;;  %v1095_v21 = vld [vmem:[%s1430_s1 + $0xd0] sm:$0xff]  }
   0x7   :  { %v1088_v14 = vld [vmem:[%s1430_s1 + $0x20] sm:$0xff]   ;;  %v1092_v18 = vld [vmem:[%s1430_s1 + $0x18] sm:$0xff]   ;;  %v1096_v22 = vld [vmem:[%s1430_s1 + $0x10] sm:$0xff]  }
   0x8   :  { %958 = vmatpush3.bf16.msra.mxu0 %v1080_v6  ;;  %v1089_v15 = vld [vmem:[%s1430_s1 + $0xa0] sm:$0xff]   ;;  %v1093_v19 = vld [vmem:[%s1430_s1 + $0x98] sm:$0xff]   ;;  %v1097_v23 = vld [vmem:[%s1430_s1 + $0x90] sm:$0xff]  }
   0x9   :  { %980 = vmatpush3.bf16.msra.mxu1 %v1081_v7  ;;  %959 = vmatprep.subr.bf16.mxu0 %v1082_v8  ;;  %v1098_v24 = vld [vmem:[%s1430_s1 + $0x48] sm:$0xff]   ;;  %v1102_v28 = vld [vmem:[%s1430_s1 + $0x40] sm:$0xff]   ;;  %v1106_v40 = vld [vmem:[%s1430_s1 + $0x178] sm:$0xff]  }
   0xa   :  { %981 = vmatprep.subr.bf16.mxu1 %v1083_v9  ;;  %v1099_v25 = vld [vmem:[%s1430_s1 + $0xc8] sm:$0xff]   ;;  %v1103_v29 = vld [vmem:[%s1430_s1 + $0xc0] sm:$0xff]   ;;  %v1107_v41 = vld [vmem:[%s1430_s1 + $0x1f8] sm:$0xff]  }
   0xb   :  { %v1100_v26 = vld [vmem:[%s1430_s1 + $0x8] sm:$0xff]   ;;  %v1104_v30 = vld [vmem:[%s1430_s1] sm:$0xff]   ;;  %v1108_v42 = vld [vmem:[%s1430_s1 + $0x138] sm:$0xff]  }
   0xc   :  { %960 = vmatpush3.bf16.msra.mxu0 %v1084_v10  ;;  %v1101_v27 = vld [vmem:[%s1430_s1 + $0x88] sm:$0xff]   ;;  %v1105_v31 = vld [vmem:[%s1430_s1 + $0x80] sm:$0xff]   ;;  %v1109_v43 = vld [vmem:[%s1430_s1 + $0x1b8] sm:$0xff]  }
   0xd   :  { %982 = vmatpush3.bf16.msra.mxu1 %v1085_v11  ;;  %961 = vmatprep.subr.bf16.mxu0 %v1086_v12  ;;  %v21_v32 = vld [vmem:[%s1431_s0] sm:$0xff]  ;;  %v22_v34 = vld [vmem:[%s1431_s0 + $0x8] sm:$0xff]  ;;  %v1110_v44 = vld [vmem:[%s1430_s1 + $0x170] sm:$0xff]  }
   0xe   :  { %983 = vmatprep.subr.bf16.mxu1 %v1087_v13  ;;  %v25_v33 = vld [vmem:[%s1431_s0 + $0x20] sm:$0xff]  ;;  %v26_v37 = vld [vmem:[%s1431_s0 + $0x28] sm:$0xff]  ;;  %v1111_v45 = vld [vmem:[%s1430_s1 + $0x1f0] sm:$0xff]  }
   0xf   :  { %v874_v35 = vcombine.low %v21_v32, %v25_v33  ;;  %v875_v36 = vcombine.high %v21_v32, %v25_v33  ;;  %v876_v38 = vcombine.low %v22_v34, %v26_v37  ;;  %v877_v39 = vcombine.high %v22_v34, %v26_v37  ;;  %v1112_v46 = vld [vmem:[%s1430_s1 + $0x130] sm:$0xff]   ;;  %v1114_v48 = vld [vmem:[%s1430_s1 + $0x168] sm:$0xff]   ;;  %v1118_v52 = vld [vmem:[%s1430_s1 + $0x160] sm:$0xff]  }
  0x10   :  { %962 = vmatpush3.bf16.msra.mxu0 %v1088_v14  ;;  %v1113_v47 = vld [vmem:[%s1430_s1 + $0x1b0] sm:$0xff]   ;;  %v1115_v49 = vld [vmem:[%s1430_s1 + $0x1e8] sm:$0xff]   ;;  %v1119_v53 = vld [vmem:[%s1430_s1 + $0x1e0] sm:$0xff]  }
  0x11   :  { %984 = vmatpush3.bf16.msra.mxu1 %v1089_v15  ;;  %963 = vmatprep.subr.bf16.mxu0 %v1090_v16  ;;  %v1116_v50 = vld [vmem:[%s1430_s1 + $0x128] sm:$0xff]   ;;  %v1120_v54 = vld [vmem:[%s1430_s1 + $0x120] sm:$0xff]   ;;  %v1122_v56 = vld [vmem:[%s1430_s1 + $0x158] sm:$0xff]   ;;  %v1146_v16 = vmov 0.0  }
  0x12   :  { %985 = vmatprep.subr.bf16.mxu1 %v1091_v17  ;;  %620 = vmatprep.mubr.bf16.mxu0 %v875_v36  ;;  %v1117_v51 = vld [vmem:[%s1430_s1 + $0x1a8] sm:$0xff]   ;;  %v1121_v55 = vld [vmem:[%s1430_s1 + $0x1a0] sm:$0xff]   ;;  %v1123_v57 = vld [vmem:[%s1430_s1 + $0x1d8] sm:$0xff]  }
  0x13   :  { %661 = vmatprep.mubr.bf16.mxu1 %v877_v39  ;;  %v1124_v58 = vld [vmem:[%s1430_s1 + $0x118] sm:$0xff]   ;;  %v1126_v60 = vld [vmem:[%s1430_s1 + $0x150] sm:$0xff]   ;;  %v1130_v0 = vld [vmem:[%s1430_s1 + $0x148] sm:$0xff]  }
  0x14   :  { %964 = vmatpush3.bf16.msra.mxu0 %v1092_v18  ;;  %v1125_v59 = vld [vmem:[%s1430_s1 + $0x198] sm:$0xff]   ;;  %v1127_v61 = vld [vmem:[%s1430_s1 + $0x1d0] sm:$0xff]   ;;  %v1131_v1 = vld [vmem:[%s1430_s1 + $0x1c8] sm:$0xff]  }
  0x15   :  { %986 = vmatpush3.bf16.msra.mxu1 %v1093_v19  ;;  %965 = vmatprep.subr.bf16.mxu0 %v1094_v20  ;;  %v1128_v62 = vld [vmem:[%s1430_s1 + $0x110] sm:$0xff]   ;;  %v1132_v2 = vld [vmem:[%s1430_s1 + $0x108] sm:$0xff]   ;;  %v1134_v4 = vld [vmem:[%s1430_s1 + $0x140] sm:$0xff]  }
  0x16   :  { %987 = vmatprep.subr.bf16.mxu1 %v1095_v21  ;;  %v1129_v63 = vld [vmem:[%s1430_s1 + $0x190] sm:$0xff]   ;;  %v1133_v3 = vld [vmem:[%s1430_s1 + $0x188] sm:$0xff]   ;;  %v1135_v5 = vld [vmem:[%s1430_s1 + $0x1c0] sm:$0xff]  }
  0x17   :  { %v1136_v6 = vld [vmem:[%s1430_s1 + $0x100] sm:$0xff]   ;;  %v23_v8 = vld [vmem:[%s1431_s0 + $0x10] sm:$0xff]  ;;  %v24_v12 = vld [vmem:[%s1431_s0 + $0x18] sm:$0xff] }
  0x18   :  { %966 = vmatpush3.bf16.msra.mxu0 %v1096_v22  ;;  %v1137_v7 = vld [vmem:[%s1430_s1 + $0x180] sm:$0xff]   ;;  %v27_v9 = vld [vmem:[%s1431_s0 + $0x30] sm:$0xff]  ;;  %v28_v13 = vld [vmem:[%s1431_s0 + $0x38] sm:$0xff] }
  0x19   :  { %988 = vmatpush3.bf16.msra.mxu1 %v1097_v23  ;;  %967 = vmatprep.subr.bf16.mxu0 %v1098_v24  ;;  %v878_v10 = vcombine.low %v23_v8, %v27_v9  ;;  %v879_v11 = vcombine.high %v23_v8, %v27_v9  ;;  %v880_v14 = vcombine.low %v24_v12, %v28_v13  ;;  %v1138_v17 = vld [vmem:[%s1432_s3 + $0x38] sm:$0xff]   ;;  %v1139_v18 = vld [vmem:[%s1432_s3 + $0x30] sm:$0xff]   ;;  %v1140_v19 = vld [vmem:[%s1432_s3 + $0x28] sm:$0xff]  }
  0x1a   :  { %989 = vmatprep.subr.bf16.mxu1 %v1099_v25  ;;  %v881_v15 = vcombine.high %v24_v12, %v28_v13  ;;  %v1141_v20 = vld [vmem:[%s1432_s3 + $0x20] sm:$0xff]   ;;  %v1142_v21 = vld [vmem:[%s1432_s3 + $0x18] sm:$0xff]   ;;  %v1143_v22 = vld [vmem:[%s1432_s3 + $0x10] sm:$0xff]  }
  0x1b   :  { %v1144_v23 = vld [vmem:[%s1432_s3 + $0x8] sm:$0xff]   ;;  %v1145_v24 = vld [vmem:[%s1432_s3] sm:$0xff]  }
  0x1c   :  { %968 = vmatpush3.bf16.msra.mxu0 %v1100_v26  ;;  %v873_v32 = vld [vmem:[%s1433_s2] ss:$0 sm:$0xff] }
  0x1d   :  { %990 = vmatpush3.bf16.msra.mxu1 %v1101_v27  ;;  %969 = vmatprep.subr.bf16.mxu0 %v1102_v28 }
  0x1e   :  { %991 = vmatprep.subr.bf16.mxu1 %v1103_v29 }
  0x20   :  { %970 = vmatpush3.bf16.msra.mxu0 %v1104_v30 }
  0x21   :  { %992 = vmatpush3.bf16.msra.mxu1 %v1105_v31  ;;  %999 = vmatprep.subr.bf16.mxu0 %v1106_v40 }
  0x22   :  { %1021 = vmatprep.subr.bf16.mxu1 %v1107_v41 }
  0x23   :  { %621 = vmatmul.mubr.bf16.vlgmr.msra.gmra.mxu0 %v874_v35 }
  0x24   :  { %662 = vmatmul.mubr.bf16.vlgmr.msra.gmra.mxu1 %v876_v38  ;;  %1000 = vmatpush3.bf16.msra.mxu0 %v1108_v42 }
  0x25   :  { %1022 = vmatpush3.bf16.msra.mxu1 %v1109_v43  ;;  %1001 = vmatprep.subr.bf16.mxu0 %v1110_v44 }
  0x26   :  { %1023 = vmatprep.subr.bf16.mxu1 %v1111_v45  ;;  %702 = vmatprep.mubr.bf16.mxu0 %v879_v11 }
  0x27   :  { %743 = vmatprep.mubr.bf16.mxu1 %v881_v15 }
  0x28   :  { %1002 = vmatpush3.bf16.msra.mxu0 %v1112_v46 }
  0x29   :  { %1024 = vmatpush3.bf16.msra.mxu1 %v1113_v47  ;;  %1003 = vmatprep.subr.bf16.mxu0 %v1114_v48 }
  0x2a   :  { %1025 = vmatprep.subr.bf16.mxu1 %v1115_v49 }
  0x2c   :  { %1004 = vmatpush3.bf16.msra.mxu0 %v1116_v50 }
  0x2d   :  { %1026 = vmatpush3.bf16.msra.mxu1 %v1117_v51  ;;  %1005 = vmatprep.subr.bf16.mxu0 %v1118_v52 }
  0x2e   :  { %1027 = vmatprep.subr.bf16.mxu1 %v1119_v53 }
  0x30   :  { %1006 = vmatpush3.bf16.msra.mxu0 %v1120_v54 }
  0x31   :  { %1028 = vmatpush3.bf16.msra.mxu1 %v1121_v55  ;;  %1007 = vmatprep.subr.bf16.mxu0 %v1122_v56 }
  0x32   :  { %1029 = vmatprep.subr.bf16.mxu1 %v1123_v57 }
  0x34   :  { %1008 = vmatpush3.bf16.msra.mxu0 %v1124_v58 }
  0x35   :  { %1030 = vmatpush3.bf16.msra.mxu1 %v1125_v59  ;;  %1009 = vmatprep.subr.bf16.mxu0 %v1126_v60 }
  0x36   :  { %1031 = vmatprep.subr.bf16.mxu1 %v1127_v61  ;;  %v946_v61 = vld [vmem:[%s1434_s4] ss:$0 sm:$0xff] }
  0x38   :  { %1010 = vmatpush3.bf16.msra.mxu0 %v1128_v62 }
  0x39   :  { %1032 = vmatpush3.bf16.msra.mxu1 %v1129_v63  ;;  %1011 = vmatprep.subr.bf16.mxu0 %v1130_v0 }
  0x3a   :  { %1033 = vmatprep.subr.bf16.mxu1 %v1131_v1 }
  0x3c   :  { %1012 = vmatpush3.bf16.msra.mxu0 %v1132_v2 }
  0x3d   :  { %1034 = vmatpush3.bf16.msra.mxu1 %v1133_v3  ;;  %1013 = vmatprep.subr.bf16.mxu0 %v1134_v4 }
  0x3e   :  { %1035 = vmatprep.subr.bf16.mxu1 %v1135_v5 }
  0x40   :  { %1014 = vmatpush3.bf16.msra.mxu0 %v1136_v6 }
  0x41   :  { %1036 = vmatpush3.bf16.msra.mxu1 %v1137_v7  ;;  %1052 = vmatprep.subr.bf16.mxu0 %v1146_v16 }
  0x43   :  { %703 = vmatmul.mubr.bf16.vlgmr.msra.gmra.mxu0 %v878_v10 }
  0x44   :  { %744 = vmatmul.mubr.bf16.vlgmr.msra.gmra.mxu1 %v880_v14  ;;  %1053 = vmatpush3.bf16.msra.mxu0 %v1138_v17 }
  0x45   :  { %1054 = vmatprep.subr.bf16.mxu0 %v1146_v16  ;;  %1068 = vmatprep.mubr.msk.bf16.mxu0 %vm1147_vm0, %v1146_v16 }
  0x48   :  { %1055 = vmatpush3.bf16.msra.mxu0 %v1139_v18 }
  0x49   :  { %1056 = vmatprep.subr.bf16.mxu0 %v1146_v16 }
  0x4c   :  { %1057 = vmatpush3.bf16.msra.mxu0 %v1140_v19 }
  0x4d   :  { %1058 = vmatprep.subr.bf16.mxu0 %v1146_v16 }
  0x50   :  { %1059 = vmatpush3.bf16.msra.mxu0 %v1141_v20 }
  0x51   :  { %1060 = vmatprep.subr.bf16.mxu0 %v1146_v16 }
  0x54   :  { %1061 = vmatpush3.bf16.msra.mxu0 %v1142_v21 }
  0x55   :  { %1062 = vmatprep.subr.bf16.mxu0 %v1146_v16 }
  0x58   :  { %1063 = vmatpush3.bf16.msra.mxu0 %v1143_v22 }
  0x59   :  { %1064 = vmatprep.subr.bf16.mxu0 %v1146_v16 }
  0x5c   :  { %1065 = vmatpush3.bf16.msra.mxu0 %v1144_v23 }
  0x5d   :  { %1066 = vmatprep.subr.bf16.mxu0 %v1146_v16 }
  0x60   :  { %1067 = vmatpush3.bf16.msra.mxu0 %v1145_v24 }
  0xe3   :  { %v971_v25 = vpop.f32.mrf.mxu0 }
  0xe4   :  { %v993_v26 = vpop.f32.mrf.mxu1 }
  0xe5   :  { %v972_v27 = vpop.f32.mrf.mxu0 }
  0xe6   :  { %v994_v28 = vpop.f32.mrf.mxu1  ;;  %v973_v30 = vadd.f32 %v972_v27, %v971_v25 }
  0xe7   :  { %v974_v29 = vpop.f32.mrf.mxu0  ;;  %v995_v35 = vadd.f32 %v994_v28, %v993_v26 }
  0xe8   :  { %v996_v31 = vpop.f32.mrf.mxu1  ;;  %v623_v34 = vadd.f32 %v973_v30, %v873_v32 }
  0xe9   :  { %v975_v33 = vpop.f32.mrf.mxu0 }
  0xea   :  { %v976_v36 = vadd.f32 %v975_v33, %v974_v29  ;;  %v997_v37 = vpop.f32.mrf.mxu1  ;;  %v664_v41 = vadd.f32 %v995_v35, %v623_v34 }
  0xeb   :  { %v998_v46 = vadd.f32 %v997_v37, %v996_v31 }
  0xec   :  { %v626_v42 = vadd.f32 %v976_v36, %v873_v32 }
  0xee   :  { %v667_v50 = vadd.f32 %v998_v46, %v626_v42 }
 0x103   :  { %v1015_v38 = vpop.f32.mrf.mxu0 }
 0x104   :  { %v1037_v39 = vpop.f32.mrf.mxu1 }
 0x105   :  { %v1016_v40 = vpop.f32.mrf.mxu0 }
 0x106   :  { %v1017_v43 = vadd.f32 %v1016_v40, %v1015_v38  ;;  %v1038_v44 = vpop.f32.mrf.mxu1 }
 0x107   :  { %v1018_v45 = vpop.f32.mrf.mxu0  ;;  %v1039_v51 = vadd.f32 %v1038_v44, %v1037_v39 }
 0x108   :  { %v705_v47 = vadd.f32 %v1017_v43, %v664_v41  ;;  %v1040_v48 = vpop.f32.mrf.mxu1 }
 0x109   :  { %v1019_v49 = vpop.f32.mrf.mxu0 }
 0x10a   :  { %v1020_v52 = vadd.f32 %v1019_v49, %v1018_v45  ;;  %v1041_v53 = vpop.f32.mrf.mxu1  ;;  %v746_v54 = vadd.f32 %v1039_v51, %v705_v47 }
 0x10b   :  { %v1042_v56 = vadd.f32 %v1041_v53, %v1040_v48 }
 0x10c   :  { %v708_v55 = vadd.f32 %v1020_v52, %v667_v50  ;;  %v752_v58 = vmax.f32 %v746_v54, 0.0 }
 0x10e   :  { %v749_v57 = vadd.f32 %v1042_v56, %v708_v55 }
 0x110   :  { %v753_v59 = vmax.f32 %v749_v57, 0.0 }
 0x112   :  { %v754_v60 = vpack.c.bf16 %v753_v59, %v752_v58 }
 0x114   :  { %1069 = vmatmul.mubr.bf16.vlgmr.msra.gmra.mxu0 %v754_v60 }
 0x1d4   :  { %v860_v62 = vpop.f32.mrf.mxu0 }
 0x1d5   :  { %v861_v63 = vadd.f32 %v946_v61, %v860_v62 }
 0x1d6   :  { %v1070_v0 = vpop.f32.mrf.mxu0 }
 0x1d7   :  { %867 = vst [vmem:[%s1435_s5] sm:$0xff] %v861_v63 }
 0x1d8   :  { %v863_v1 = vpop.f32.mrf.mxu0 }
 0x1d9   :  { %v864_v2 = vadd.f32 %v946_v61, %v863_v1 }
 0x1da   :  { %v1071_v3 = vpop.f32.mrf.mxu0 }
 0x1db   :  { %868 = vst [vmem:[%s1435_s5 + $0x8] sm:$0xff] %v864_v2 }

</bundles_post_ra>
